<compile_context>
chip_gen: v6e
topology: v6e:2x2x1
jax: 0.10.0
libtpu: 0.0.40
codegen_flags: <defaults>
</compile_context>

<pallas_src>
import jax
import jax.numpy as jnp
from jax.experimental import pallas as pl
from jax.experimental.pallas import tpu as pltpu


def _round_up(x, m):
    return (x + m - 1) // m * m


def mlp_kernel(x_ref, w1_ref, b1_ref, w2_ref, b2_ref, w3_ref, b3_ref, o_ref):
    # Cast the streamed x tile to the weights' compute dtype AFTER the VMEM load
    # (avoids a separate wrapper-side HBM cast pass; VPU has slack here).
    x = x_ref[...].astype(w1_ref.dtype)

    # Layer 1: MXU matmul with f32 accumulation; bias add + tanh stay f32
    # (safe on v5e, which has no bf16 VPU/EUP).
    h = jnp.dot(x, w1_ref[...], preferred_element_type=jnp.float32) + b1_ref[...]
    h = jnp.tanh(h).astype(w2_ref.dtype)

    # Layer 2.
    h = jnp.dot(h, w2_ref[...], preferred_element_type=jnp.float32) + b2_ref[...]
    h = jnp.tanh(h).astype(w3_ref.dtype)

    # Layer 3 (no activation).
    y = jnp.dot(h, w3_ref[...], preferred_element_type=jnp.float32) + b3_ref[...]
    o_ref[...] = y.astype(o_ref.dtype)


def prepare_params(params, *, compute_dtype=jnp.bfloat16, pad_output=False):
    """One-time weight preparation (call once at init, NOT per forward).

    - weights -> compute_dtype (bf16 default: halves resident VMEM / HBM traffic,
      several-x faster MXU on all generations; biases stay f32).
    - hidden dim zero-padded to a multiple of 128 (lane-dense intermediates and
      MXU N-dims; mathematically a no-op).
    - optionally pad the output dim to 128 for lane-dense vst stores (output is
      sliced back in the wrapper; only worth it when x-read traffic dominates).
    Weights are expected as [in, out] (already transposed from PyTorch's [out, in]).
    """
    w1, w2, w3 = params["w1"], params["w2"], params["w3"]
    b1, b2, b3 = params["b1"], params["b2"], params["b3"]
    in_dim, hid = w1.shape
    out_dim = w3.shape[1]

    hid_p = _round_up(hid, 128)
    out_p = _round_up(out_dim, 128) if pad_output else out_dim

    def pad2(a, rows, cols):
        r, c = a.shape
        return jnp.pad(a, ((0, rows - r), (0, cols - c)))

    return {
        "w1": pad2(w1, in_dim, hid_p).astype(compute_dtype),
        "b1": pad2(b1, 1, hid_p).astype(jnp.float32),
        "w2": pad2(w2, hid_p, hid_p).astype(compute_dtype),
        "b2": pad2(b2, 1, hid_p).astype(jnp.float32),
        "w3": pad2(w3, hid_p, out_p).astype(compute_dtype),
        "b3": pad2(b3, 1, out_p).astype(jnp.float32),
        "out_dim": out_dim,
    }


# Flipped to False (once) if this jax build rejects pl.Buffered(1) on a BlockSpec.
_SINGLE_BUFFER_WEIGHTS_OK = True


def baseline_mlp_forward(x, prepared, *, tm_max=512, tm=None):
    """x: [B, input_dim] (any float dtype; cast in-kernel). prepared: prepare_params()."""
    global _SINGLE_BUFFER_WEIGHTS_OK

    w1, b1 = prepared["w1"], prepared["b1"]
    w2, b2 = prepared["w2"], prepared["b2"]
    w3, b3 = prepared["w3"], prepared["b3"]
    out_dim = prepared["out_dim"]

    B, in_dim = x.shape
    hid_p = w1.shape[1]
    out_p = w3.shape[1]

    # ---- batch tile selection -------------------------------------------------
    if tm is None:
        if B <= 256:
            tm = B  # single full-extent tile (legal block shape: block == full dim)
        else:
            # >= 2 grid steps (DMA/compute overlap + v7x 2-TC sharding), MXU-granular
            # 256-multiples, capped at tm_max so tiles + resident weights fit the
            # smallest VMEM budget (v7x 64 MiB physical, v5e 16 MiB scoped default).
            tm = int(min(tm_max, _round_up(pl.cdiv(B, 2), 256)))
    grid_b = pl.cdiv(B, tm)  # partial trailing block handled by Pallas (no jnp.pad)

    # ---- VMEM budget (explicit scoped limit) & cost hint ------------------------
    xb = x.dtype.itemsize
    wb = w1.dtype.itemsize
    weight_bytes = (w1.size + w2.size + w3.size) * wb + (b1.size + b2.size + b3.size) * 4
    stream_bytes = 2 * tm * (in_dim * xb + out_p * 4)   # double-buffered x-in / y-out tiles
    interm_bytes = 3 * tm * hid_p * 4                   # f32 h1/h2 temps (+ slack)
    needed = 2 * weight_bytes + stream_bytes + interm_bytes
    vmem_limit = int(min(max(needed * 3 // 2 + (4 << 20), 32 << 20), 64 << 20))

    cost = pl.CostEstimate(
        flops=2 * B * (in_dim * hid_p + hid_p * hid_p + hid_p * out_p),
        transcendentals=2 * B * hid_p,
        bytes_accessed=B * in_dim * xb + B * out_p * 4 + weight_bytes,
    )

    # ---- pallas_call ------------------------------------------------------------
    def call(single_buffer_weights):
        if single_buffer_weights:
            def w_spec(shape):
                return pl.BlockSpec(shape, lambda i: (0, 0),
                                    pipeline_mode=pl.Buffered(1))
        else:
            def w_spec(shape):
                return pl.BlockSpec(shape, lambda i: (0, 0))

        return pl.pallas_call(
            mlp_kernel,
            out_shape=jax.ShapeDtypeStruct((B, out_p), jnp.float32),
            grid=(grid_b,),
            in_specs=[
                pl.BlockSpec((tm, in_dim), lambda i: (i, 0)),   # streamed x tile
                w_spec(w1.shape), w_spec(b1.shape),             # resident weights/biases
                w_spec(w2.shape), w_spec(b2.shape),
                w_spec(w3.shape), w_spec(b3.shape),
            ],
            out_specs=pl.BlockSpec((tm, out_p), lambda i: (i, 0)),
            compiler_params=pltpu.CompilerParams(
                dimension_semantics=("parallel",),   # megacore split on v7x
                vmem_limit_bytes=vmem_limit,
            ),
            cost_estimate=cost,
        )(x, w1, b1, w2, b2, w3, b3)

    out = None
    if _SINGLE_BUFFER_WEIGHTS_OK:
        try:
            out = call(single_buffer_weights=True)
        except Exception:
            _SINGLE_BUFFER_WEIGHTS_OK = False  # Buffered(1) unsupported -> default buffering
    if out is None:
        out = call(single_buffer_weights=False)

    if out_p != out_dim:
        out = out[:, :out_dim]
    return out


# ----------------------------- reference / init ---------------------------------

def _orthogonal(key, out_dim, in_dim, dtype=jnp.float32):
    # Matches nn.init.orthogonal_ semantics (deterministic given key).
    return jax.nn.initializers.orthogonal()(key, (out_dim, in_dim), dtype)


def make_params(key, input_dim, hidden_dim, output_dim):
    k = jax.random.split(key, 6)

    # PyTorch nn.Linear default bias init: U(-1/sqrt(fan_in), 1/sqrt(fan_in)).
    def bias(kk, fan_in, dim):
        bound = 1.0 / jnp.sqrt(fan_in)
        return jax.random.uniform(kk, (1, dim), jnp.float32, -bound, bound)

    w1 = _orthogonal(k[0], hidden_dim, input_dim)   # [out, in] like PyTorch
    w2 = _orthogonal(k[1], hidden_dim, hidden_dim)
    w3 = _orthogonal(k[2], output_dim, hidden_dim)
    return {
        "w1": w1.T, "b1": bias(k[3], input_dim, hidden_dim),    # stored as [in, out]
        "w2": w2.T, "b2": bias(k[4], hidden_dim, hidden_dim),
        "w3": w3.T, "b3": bias(k[5], hidden_dim, output_dim),
    }


def reference_forward(x, params):
    h = jnp.tanh(x @ params["w1"] + params["b1"])
    h = jnp.tanh(h @ params["w2"] + params["b2"])
    return h @ params["w3"] + params["b3"]


if __name__ == "__main__":
    input_dim, hidden_dim, output_dim = 16, 32, 8
    batch = 8

    key = jax.random.PRNGKey(0)
    kx, kp = jax.random.split(key)
    x = jax.random.normal(kx, (batch, input_dim), jnp.float32)
    params = make_params(kp, input_dim, hidden_dim, output_dim)
    ref = reference_forward(x, params)

    # 1) f32 weights (exact module semantics), hidden dim lane-padded to 128.
    prep_f32 = prepare_params(params, compute_dtype=jnp.float32)
    out_f32 = jax.block_until_ready(baseline_mlp_forward(x, prep_f32))
    assert out_f32.shape == (batch, output_dim)
    assert jnp.allclose(out_f32, ref, atol=1e-5, rtol=1e-5), "f32 mismatch vs reference"

    # 2) Default bf16 weight storage, in-kernel x cast, f32 accumulation/tanh.
    prep_bf16 = prepare_params(params)
    out_bf16 = jax.block_until_ready(baseline_mlp_forward(x, prep_bf16))
    assert jnp.allclose(out_bf16, ref, atol=3e-2, rtol=3e-2), "bf16 mismatch vs reference"

    # 3) Multi-step grid with a partial trailing block (B=20, tm=8 -> 3 steps, no
    #    input padding) and lane-dense (128-wide) padded output stores.
    x_big = jax.random.normal(kx, (20, input_dim), jnp.float32)
    prep_pad = prepare_params(params, compute_dtype=jnp.float32, pad_output=True)
    out_big = jax.block_until_ready(baseline_mlp_forward(x_big, prep_pad, tm=8))
    ref_big = reference_forward(x_big, params)
    assert out_big.shape == (20, output_dim)
    assert jnp.allclose(out_big, ref_big, atol=1e-5, rtol=1e-5), "tiled mismatch vs reference"

    print("KERNEL_OK")
</pallas_src>

<mosaic_0001>
module attributes {stable_mosaic.version = 11 : i64} {
  func.func @mlp_kernel(%arg0: i32, %arg1: memref<8x16xf32, #tpu.memory_space<vmem>>, %arg2: memref<16x128xf32, #tpu.memory_space<vmem>>, %arg3: memref<1x128xf32, #tpu.memory_space<vmem>>, %arg4: memref<128x128xf32, #tpu.memory_space<vmem>>, %arg5: memref<1x128xf32, #tpu.memory_space<vmem>>, %arg6: memref<128x8xf32, #tpu.memory_space<vmem>>, %arg7: memref<1x8xf32, #tpu.memory_space<vmem>>, %arg8: memref<8x8xf32, #tpu.memory_space<vmem>>) attributes {dimension_semantics = [#tpu.dimension_semantics<parallel>], iteration_bounds = array<i64: 1>, scalar_prefetch = 0 : i64, scratch_operands = 0 : i64, tpu.core_type = #tpu.core_type<tc>, window_params = [{transform_indices = @transform_0, window_bounds = array<i64: 8, 16>}, {pipeline_mode = #tpu.pipeline_mode<synchronous>, transform_indices = @transform_1, window_bounds = array<i64: 16, 128>}, {pipeline_mode = #tpu.pipeline_mode<synchronous>, transform_indices = @transform_2, window_bounds = array<i64: 1, 128>}, {pipeline_mode = #tpu.pipeline_mode<synchronous>, transform_indices = @transform_3, window_bounds = array<i64: 128, 128>}, {pipeline_mode = #tpu.pipeline_mode<synchronous>, transform_indices = @transform_4, window_bounds = array<i64: 1, 128>}, {pipeline_mode = #tpu.pipeline_mode<synchronous>, transform_indices = @transform_5, window_bounds = array<i64: 128, 8>}, {pipeline_mode = #tpu.pipeline_mode<synchronous>, transform_indices = @transform_6, window_bounds = array<i64: 1, 8>}, {transform_indices = @transform_7, window_bounds = array<i64: 8, 8>}]} {
    %c0 = arith.constant 0 : index
    %c0_0 = arith.constant 0 : index
    %0 = vector.load %arg1[%c0, %c0_0] : memref<8x16xf32, #tpu.memory_space<vmem>>, vector<8x16xf32>
    %c0_1 = arith.constant 0 : index
    %c0_2 = arith.constant 0 : index
    %1 = vector.load %arg2[%c0_1, %c0_2] : memref<16x128xf32, #tpu.memory_space<vmem>>, vector<16x128xf32>
    %cst = arith.constant dense<0.000000e+00> : vector<8x128xf32>
    %2 = tpu.matmul %0, %1, %cst {dimension_numbers = #tpu.dot_dimension_numbers<[1], [0], [0], [1], [0, 0, 1, 1], [], []>} : vector<8x16xf32>, vector<16x128xf32>, vector<8x128xf32> -> vector<8x128xf32>
    %c0_3 = arith.constant 0 : index
    %c0_4 = arith.constant 0 : index
    %3 = vector.load %arg3[%c0_3, %c0_4] : memref<1x128xf32, #tpu.memory_space<vmem>>, vector<1x128xf32>
    %4 = vector.broadcast %3 : vector<1x128xf32> to vector<8x128xf32>
    %5 = arith.addf %2, %4 : vector<8x128xf32>
    %6 = math.tanh %5 : vector<8x128xf32>
    %c0_5 = arith.constant 0 : index
    %c0_6 = arith.constant 0 : index
    %7 = vector.load %arg4[%c0_5, %c0_6] : memref<128x128xf32, #tpu.memory_space<vmem>>, vector<128x128xf32>
    %cst_7 = arith.constant dense<0.000000e+00> : vector<8x128xf32>
    %8 = tpu.matmul %6, %7, %cst_7 {dimension_numbers = #tpu.dot_dimension_numbers<[1], [0], [0], [1], [0, 0, 1, 1], [], []>} : vector<8x128xf32>, vector<128x128xf32>, vector<8x128xf32> -> vector<8x128xf32>
    %c0_8 = arith.constant 0 : index
    %c0_9 = arith.constant 0 : index
    %9 = vector.load %arg5[%c0_8, %c0_9] : memref<1x128xf32, #tpu.memory_space<vmem>>, vector<1x128xf32>
    %10 = vector.broadcast %9 : vector<1x128xf32> to vector<8x128xf32>
    %11 = arith.addf %8, %10 : vector<8x128xf32>
    %12 = math.tanh %11 : vector<8x128xf32>
    %c0_10 = arith.constant 0 : index
    %c0_11 = arith.constant 0 : index
    %13 = vector.load %arg6[%c0_10, %c0_11] : memref<128x8xf32, #tpu.memory_space<vmem>>, vector<128x8xf32>
    %cst_12 = arith.constant dense<0.000000e+00> : vector<8x8xf32>
    %14 = tpu.matmul %12, %13, %cst_12 {dimension_numbers = #tpu.dot_dimension_numbers<[1], [0], [0], [1], [0, 0, 1, 1], [], []>} : vector<8x128xf32>, vector<128x8xf32>, vector<8x8xf32> -> vector<8x8xf32>
    %c0_13 = arith.constant 0 : index
    %c0_14 = arith.constant 0 : index
    %15 = vector.load %arg7[%c0_13, %c0_14] : memref<1x8xf32, #tpu.memory_space<vmem>>, vector<1x8xf32>
    %16 = vector.broadcast %15 : vector<1x8xf32> to vector<8x8xf32>
    %17 = arith.addf %14, %16 : vector<8x8xf32>
    %c0_15 = arith.constant 0 : index
    %c0_16 = arith.constant 0 : index
    %18 = vector.load %arg8[%c0_15, %c0_16] : memref<8x8xf32, #tpu.memory_space<vmem>>, vector<8x8xf32>
    tpu.vector_store %arg8[%c0_15, %c0_16], %17 {strides = array<i32>} : memref<8x8xf32, #tpu.memory_space<vmem>>, vector<8x8xf32>,
    return
  }
  func.func @transform_0(%arg0: i32) -> (i32, i32) {
    %c0_i32 = arith.constant 0 : i32
    %c0_i32_0 = arith.constant 0 : i32
    return %arg0, %c0_i32 : i32, i32
  }
  func.func @transform_1(%arg0: i32) -> (i32, i32) {
    %c0_i32 = arith.constant 0 : i32
    %c0_i32_0 = arith.constant 0 : i32
    %c0_i32_1 = arith.constant 0 : i32
    return %c0_i32, %c0_i32_0 : i32, i32
  }
  func.func @transform_2(%arg0: i32) -> (i32, i32) {
    %c0_i32 = arith.constant 0 : i32
    %c0_i32_0 = arith.constant 0 : i32
    %c0_i32_1 = arith.constant 0 : i32
    return %c0_i32, %c0_i32_0 : i32, i32
  }
  func.func @transform_3(%arg0: i32) -> (i32, i32) {
    %c0_i32 = arith.constant 0 : i32
    %c0_i32_0 = arith.constant 0 : i32
    %c0_i32_1 = arith.constant 0 : i32
    return %c0_i32, %c0_i32_0 : i32, i32
  }
  func.func @transform_4(%arg0: i32) -> (i32, i32) {
    %c0_i32 = arith.constant 0 : i32
    %c0_i32_0 = arith.constant 0 : i32
    %c0_i32_1 = arith.constant 0 : i32
    return %c0_i32, %c0_i32_0 : i32, i32
  }
  func.func @transform_5(%arg0: i32) -> (i32, i32) {
    %c0_i32 = arith.constant 0 : i32
    %c0_i32_0 = arith.constant 0 : i32
    %c0_i32_1 = arith.constant 0 : i32
    return %c0_i32, %c0_i32_0 : i32, i32
  }
  func.func @transform_6(%arg0: i32) -> (i32, i32) {
    %c0_i32 = arith.constant 0 : i32
    %c0_i32_0 = arith.constant 0 : i32
    %c0_i32_1 = arith.constant 0 : i32
    return %c0_i32, %c0_i32_0 : i32, i32
  }
  func.func @transform_7(%arg0: i32) -> (i32, i32) {
    %c0_i32 = arith.constant 0 : i32
    %c0_i32_0 = arith.constant 0 : i32
    return %arg0, %c0_i32 : i32, i32
  }
}

module attributes {stable_mosaic.version = 11 : i64} {
  func.func @mlp_kernel(%arg0: i32, %arg1: memref<8x16xf32, #tpu.memory_space<vmem>>, %arg2: memref<16x128xf32, #tpu.memory_space<vmem>>, %arg3: memref<1x128xf32, #tpu.memory_space<vmem>>, %arg4: memref<128x128xf32, #tpu.memory_space<vmem>>, %arg5: memref<1x128xf32, #tpu.memory_space<vmem>>, %arg6: memref<128x8xf32, #tpu.memory_space<vmem>>, %arg7: memref<1x8xf32, #tpu.memory_space<vmem>>, %arg8: memref<8x8xf32, #tpu.memory_space<vmem>>) attributes {dimension_semantics = [#tpu.dimension_semantics<parallel>], iteration_bounds = array<i64: 1>, scalar_prefetch = 0 : i64, scratch_operands = 0 : i64, tpu.core_type = #tpu.core_type<tc>, window_params = [{transform_indices = @transform_0, window_bounds = array<i64: 8, 16>}, {pipeline_mode = #tpu.pipeline_mode<synchronous>, transform_indices = @transform_1, window_bounds = array<i64: 16, 128>}, {pipeline_mode = #tpu.pipeline_mode<synchronous>, transform_indices = @transform_2, window_bounds = array<i64: 1, 128>}, {pipeline_mode = #tpu.pipeline_mode<synchronous>, transform_indices = @transform_3, window_bounds = array<i64: 128, 128>}, {pipeline_mode = #tpu.pipeline_mode<synchronous>, transform_indices = @transform_4, window_bounds = array<i64: 1, 128>}, {pipeline_mode = #tpu.pipeline_mode<synchronous>, transform_indices = @transform_5, window_bounds = array<i64: 128, 8>}, {pipeline_mode = #tpu.pipeline_mode<synchronous>, transform_indices = @transform_6, window_bounds = array<i64: 1, 8>}, {transform_indices = @transform_7, window_bounds = array<i64: 8, 8>}]} {
    %c0 = arith.constant 0 : index
    %c0_0 = arith.constant 0 : index
    %0 = vector.load %arg1[%c0, %c0_0] : memref<8x16xf32, #tpu.memory_space<vmem>>, vector<8x16xf32>
    %c0_1 = arith.constant 0 : index
    %c0_2 = arith.constant 0 : index
    %1 = vector.load %arg2[%c0_1, %c0_2] : memref<16x128xf32, #tpu.memory_space<vmem>>, vector<16x128xf32>
    %cst = arith.constant dense<0.000000e+00> : vector<8x128xf32>
    %2 = tpu.matmul %0, %1, %cst {dimension_numbers = #tpu.dot_dimension_numbers<[1], [0], [0], [1], [0, 0, 1, 1], [], []>} : vector<8x16xf32>, vector<16x128xf32>, vector<8x128xf32> -> vector<8x128xf32>
    %c0_3 = arith.constant 0 : index
    %c0_4 = arith.constant 0 : index
    %3 = vector.load %arg3[%c0_3, %c0_4] : memref<1x128xf32, #tpu.memory_space<vmem>>, vector<1x128xf32>
    %4 = vector.broadcast %3 : vector<1x128xf32> to vector<8x128xf32>
    %5 = arith.addf %2, %4 : vector<8x128xf32>
    %6 = math.tanh %5 : vector<8x128xf32>
    %c0_5 = arith.constant 0 : index
    %c0_6 = arith.constant 0 : index
    %7 = vector.load %arg4[%c0_5, %c0_6] : memref<128x128xf32, #tpu.memory_space<vmem>>, vector<128x128xf32>
    %cst_7 = arith.constant dense<0.000000e+00> : vector<8x128xf32>
    %8 = tpu.matmul %6, %7, %cst_7 {dimension_numbers = #tpu.dot_dimension_numbers<[1], [0], [0], [1], [0, 0, 1, 1], [], []>} : vector<8x128xf32>, vector<128x128xf32>, vector<8x128xf32> -> vector<8x128xf32>
    %c0_8 = arith.constant 0 : index
    %c0_9 = arith.constant 0 : index
    %9 = vector.load %arg5[%c0_8, %c0_9] : memref<1x128xf32, #tpu.memory_space<vmem>>, vector<1x128xf32>
    %10 = vector.broadcast %9 : vector<1x128xf32> to vector<8x128xf32>
    %11 = arith.addf %8, %10 : vector<8x128xf32>
    %12 = math.tanh %11 : vector<8x128xf32>
    %c0_10 = arith.constant 0 : index
    %c0_11 = arith.constant 0 : index
    %13 = vector.load %arg6[%c0_10, %c0_11] : memref<128x8xf32, #tpu.memory_space<vmem>>, vector<128x8xf32>
    %cst_12 = arith.constant dense<0.000000e+00> : vector<8x8xf32>
    %14 = tpu.matmul %12, %13, %cst_12 {dimension_numbers = #tpu.dot_dimension_numbers<[1], [0], [0], [1], [0, 0, 1, 1], [], []>} : vector<8x128xf32>, vector<128x8xf32>, vector<8x8xf32> -> vector<8x8xf32>
    %c0_13 = arith.constant 0 : index
    %c0_14 = arith.constant 0 : index
    %15 = vector.load %arg7[%c0_13, %c0_14] : memref<1x8xf32, #tpu.memory_space<vmem>>, vector<1x8xf32>
    %16 = vector.broadcast %15 : vector<1x8xf32> to vector<8x8xf32>
    %17 = arith.addf %14, %16 : vector<8x8xf32>
    %c0_15 = arith.constant 0 : index
    %c0_16 = arith.constant 0 : index
    %18 = vector.load %arg8[%c0_15, %c0_16] : memref<8x8xf32, #tpu.memory_space<vmem>>, vector<8x8xf32>
    tpu.vector_store %arg8[%c0_15, %c0_16], %17 {strides = array<i32>} : memref<8x8xf32, #tpu.memory_space<vmem>>, vector<8x8xf32>,
    return
  }
  func.func @transform_0(%arg0: i32) -> (i32, i32) {
    %c0_i32 = arith.constant 0 : i32
    %c0_i32_0 = arith.constant 0 : i32
    return %arg0, %c0_i32 : i32, i32
  }
  func.func @transform_1(%arg0: i32) -> (i32, i32) {
    %c0_i32 = arith.constant 0 : i32
    %c0_i32_0 = arith.constant 0 : i32
    %c0_i32_1 = arith.constant 0 : i32
    return %c0_i32, %c0_i32_0 : i32, i32
  }
  func.func @transform_2(%arg0: i32) -> (i32, i32) {
    %c0_i32 = arith.constant 0 : i32
    %c0_i32_0 = arith.constant 0 : i32
    %c0_i32_1 = arith.constant 0 : i32
    return %c0_i32, %c0_i32_0 : i32, i32
  }
  func.func @transform_3(%arg0: i32) -> (i32, i32) {
    %c0_i32 = arith.constant 0 : i32
    %c0_i32_0 = arith.constant 0 : i32
    %c0_i32_1 = arith.constant 0 : i32
    return %c0_i32, %c0_i32_0 : i32, i32
  }
  func.func @transform_4(%arg0: i32) -> (i32, i32) {
    %c0_i32 = arith.constant 0 : i32
    %c0_i32_0 = arith.constant 0 : i32
    %c0_i32_1 = arith.constant 0 : i32
    return %c0_i32, %c0_i32_0 : i32, i32
  }
  func.func @transform_5(%arg0: i32) -> (i32, i32) {
    %c0_i32 = arith.constant 0 : i32
    %c0_i32_0 = arith.constant 0 : i32
    %c0_i32_1 = arith.constant 0 : i32
    return %c0_i32, %c0_i32_0 : i32, i32
  }
  func.func @transform_6(%arg0: i32) -> (i32, i32) {
    %c0_i32 = arith.constant 0 : i32
    %c0_i32_0 = arith.constant 0 : i32
    %c0_i32_1 = arith.constant 0 : i32
    return %c0_i32, %c0_i32_0 : i32, i32
  }
  func.func @transform_7(%arg0: i32) -> (i32, i32) {
    %c0_i32 = arith.constant 0 : i32
    %c0_i32_0 = arith.constant 0 : i32
    return %arg0, %c0_i32 : i32, i32
  }
}

</mosaic_0001>

<bundles_post_ra>
// kernel: tpu_custom_call.1
= control target key start
LH: loop header
LB: loop body
LE: loop exit
PB: predicated region body
PF: predicated region fallthrough
CT: control target
= control target key end

     0   :  { %12 = vsyncpa [#allocation3], 0  ;;  %s739_s0 = inlined_call_operand.vmem [shape: f32[8,16], index: 0, kind: input, shape index: {}]   ;;  %s740_s1 = inlined_call_operand.hbm [shape: f32[16,128], index: 1, kind: input, shape index: {}]   ;;  %s741_s2 = inlined_call_operand.vmem [shape: f32[1,128], index: 2, kind: input, shape index: {}]   ;;  %s742_s3 = inlined_call_operand.vmem [shape: f32[128,128], index: 3, kind: input, shape index: {}]   ;;  %s743_s4 = inlined_call_operand.hbm [shape: f32[1,128], index: 4, kind: input, shape index: {}]   ;;  %s744_s5 = inlined_call_operand.vmem [shape: f32[128,8], index: 5, kind: input, shape index: {}]   ;;  %s745_s6 = inlined_call_operand.vmem [shape: f32[1,8], index: 6, kind: input, shape index: {}]   ;;  %s746_s7 = inlined_call_operand.hbm [shape: f32[8,8], index: 7, kind: output, shape index: {}]  }
   0x1   :  { %13 = vsyncpa [#allocation6], 0 }
   0x2   :  { %14 = vsyncpa [#allocation4], 0  ;;  %s538_s24 = smov [#allocation2]  }
   0x3   :  { %s22_s25 = sshll.u32 %s538_s24, 4  ;;  %s23_s25 = int_to_ptr.vmem [resolvable:$true] %s22_s25 }
   0x4   :  { %s480_s26 = scalar_lea.vmem %s23_s25, 256  ;;  %p485_p1 = scmp.lt.s32.totalorder %s23_s25, %s23_s25 }
   0x5   :  { %p481_p0 = scmp.ne.s32.totalorder %s23_s25, %s480_s26  ;;  %p486_p2 = scmp.lt.s32.totalorder %s480_s26, %s480_s26 }
   0x7   :  { %p487_p3 = por %p486_p2, %p485_p1 }
   0x9   :  { %p488_p4 = pnand %p487_p3, %p481_p0 }
   0xb   :  { %491 = shalt.err (!%p488_p4)
}
   0xc   :  { %s539_s27 = smov 128   ;;  %s540_s28 = smov 8  }
   0xd   :  { %28 = dma.hbm_to_vmem [thread:$0]  %s740_s1, 256, %s23_s25, [#allocation3], %s539_s27, %s539_s27, %s540_s28  }
   0xe   :  { %s541_s8 = smov [#allocation5]  }
   0xf   :  { %s39_s9 = sshll.u32 %s541_s8, 4  ;;  %s40_s9 = int_to_ptr.vmem [resolvable:$true] %s39_s9 }
  0x10   :  { %s500_s10 = scalar_lea.vmem %s40_s9, 16  ;;  %s504_s11 = scalar_lea.vmem %s40_s9, 32 }
  0x11   :  { %p501_p5 = scmp.ne.s32.totalorder %s40_s9, %s500_s10  ;;  %p505_p6 = scmp.lt.s32.totalorder %s40_s9, %s40_s9 }
  0x12   :  { %p506_p7 = scmp.lt.s32.totalorder %s504_s11, %s500_s10 }
  0x14   :  { %p507_p8 = por %p506_p7, %p505_p6 }
  0x16   :  { %p508_p9 = pnand %p507_p8, %p501_p5 }
  0x18   :  { %511 = shalt.err (!%p508_p9)
}
  0x19   :  { %42 = dma.hbm_to_vmem [thread:$0]  %s743_s4, 16, %s40_s9, [#allocation6]  }
  0x1a   :  { %532 = dma.done.wait [#allocation3], 256  }
  0x1b   :  { %533 = vsyncadd [#allocation3], 4294967040 }
  0x1c   :  { %534 = dma.done.wait [#allocation6], 16  }
  0x1d   :  { %535 = vsyncadd [#allocation6], 4294967280  ;;  %v542_v0 = vmov 0.0   ;;  %vm543_vm0 = vmmov 0   ;;  %v55_v1 = vld [vmem:[#allocation2 + $0x8] sm:$0xff]  ;;  %v54_v2 = vld [vmem:[#allocation2] sm:$0xff] }
  0x1e   :  { %384 = vmatprep.subr.mxu0 %v542_v0  ;;  %388 = vmatprep.mubr.msk.f32.mxu0 %vm543_vm0, %v542_v0  ;;  %v53_v3 = vld [vmem:[%s739_s0] sm:$0xff]  ;;  %vm63_vm1 = vcmask 130048   ;;  %v153_v4 = vld [vmem:[%s742_s3 + $0x78] sm:$0xff]  ;;  %v152_v5 = vld [vmem:[%s742_s3 + $0x70] sm:$0xff]  ;;  %s544_s26 = smov [#allocation7]   ;;  %vm325_vm2 = vcmask 64512  }
  0x1f   :  { %391 = vmatprep.subr.mxu1 %v542_v0  ;;  %423 = vmatprep.mubr.msk.f32.mxu1 %vm543_vm0, %v542_v0  ;;  %v151_v6 = vld [vmem:[%s742_s3 + $0x68] sm:$0xff]  ;;  %v150_v7 = vld [vmem:[%s742_s3 + $0x60] sm:$0xff]  ;;  %v149_v8 = vld [vmem:[%s742_s3 + $0x58] sm:$0xff]  ;;  %s333_s27 = sshll.u32 %s544_s26, 4  ;;  %s334_s27 = int_to_ptr.vmem [resolvable:$true] %s333_s27 }
  0x20   :  { %385 = vmatpush3.msra.mxu0 %v55_v1  ;;  %392 = vmatpush3.msra.mxu1 %v153_v4  ;;  %v148_v9 = vld [vmem:[%s742_s3 + $0x50] sm:$0xff]  ;;  %v147_v10 = vld [vmem:[%s742_s3 + $0x48] sm:$0xff]  ;;  %v146_v11 = vld [vmem:[%s742_s3 + $0x40] sm:$0xff]  ;;  %p517_p11 = scmp.lt.s32.totalorder %s334_s27, %s334_s27 }
  0x21   :  { %386 = vmatprep.subr.mxu0 %v542_v0  ;;  %393 = vmatprep.subr.mxu1 %v542_v0  ;;  %v145_v12 = vld [vmem:[%s742_s3 + $0x38] sm:$0xff]  ;;  %v144_v13 = vld [vmem:[%s742_s3 + $0x30] sm:$0xff]  ;;  %v143_v14 = vld [vmem:[%s742_s3 + $0x28] sm:$0xff] }
  0x22   :  { %387 = vmatpush3.msra.mxu0 %v54_v2  ;;  %394 = vmatpush3.msra.mxu1 %v152_v5  ;;  %v142_v15 = vld [vmem:[%s742_s3 + $0x20] sm:$0xff]  ;;  %v141_v16 = vld [vmem:[%s742_s3 + $0x18] sm:$0xff]  ;;  %v140_v17 = vld [vmem:[%s742_s3 + $0x10] sm:$0xff] }
  0x23   :  { %389 = vmatmul.mubr.msk.f32.vlgmr.msra.gmra.mxu0 %vm63_vm1, %v53_v3  ;;  %395 = vmatprep.subr.mxu1 %v542_v0  ;;  %v139_v18 = vld [vmem:[%s742_s3 + $0x8] sm:$0xff]  ;;  %v138_v19 = vld [vmem:[%s742_s3] sm:$0xff]  ;;  %v247_v20 = vld [vmem:[%s744_s5 + $0x78] sm:$0xff] }
  0x24   :  { %426 = vmatprep.subr.mxu0 %v542_v0  ;;  %396 = vmatpush3.msra.mxu1 %v151_v6  ;;  %v246_v21 = vld [vmem:[%s744_s5 + $0x70] sm:$0xff]  ;;  %v245_v22 = vld [vmem:[%s744_s5 + $0x68] sm:$0xff]  ;;  %v244_v23 = vld [vmem:[%s744_s5 + $0x60] sm:$0xff] }
  0x25   :  { %458 = vmatprep.mubr.msk.f32.mxu0 %vm543_vm0, %v542_v0  ;;  %397 = vmatprep.subr.mxu1 %v542_v0  ;;  %v243_v24 = vld [vmem:[%s744_s5 + $0x58] sm:$0xff]  ;;  %v242_v25 = vld [vmem:[%s744_s5 + $0x50] sm:$0xff]  ;;  %v241_v26 = vld [vmem:[%s744_s5 + $0x48] sm:$0xff] }
  0x26   :  { %398 = vmatpush3.msra.mxu1 %v150_v7  ;;  %427 = vmatpush3.msra.mxu0 %v247_v20  ;;  %v343_v27 = vld [vmem:[%s741_s2] ss:$0 sm:$0xff]  ;;  %v239_v33 = vld [vmem:[%s744_s5 + $0x38] sm:$0xff]  ;;  %v238_v34 = vld [vmem:[%s744_s5 + $0x30] sm:$0xff] }
  0x27   :  { %399 = vmatprep.subr.mxu1 %v542_v0  ;;  %428 = vmatprep.subr.mxu0 %v542_v0  ;;  %v240_v32 = vld [vmem:[%s744_s5 + $0x40] sm:$0xff]  ;;  %v237_v35 = vld [vmem:[%s744_s5 + $0x28] sm:$0xff]  ;;  %v235_v37 = vld [vmem:[%s744_s5 + $0x18] sm:$0xff] }
  0x28   :  { %400 = vmatpush3.msra.mxu1 %v149_v8  ;;  %429 = vmatpush3.msra.mxu0 %v246_v21  ;;  %v236_v36 = vld [vmem:[%s744_s5 + $0x20] sm:$0xff]  ;;  %v234_v38 = vld [vmem:[%s744_s5 + $0x10] sm:$0xff]  ;;  %v233_v39 = vld [vmem:[%s744_s5 + $0x8] sm:$0xff] }
  0x29   :  { %401 = vmatprep.subr.mxu1 %v542_v0  ;;  %430 = vmatprep.subr.mxu0 %v542_v0  ;;  %v232_v40 = vld [vmem:[%s744_s5] sm:$0xff]  ;;  %v345_v41 = vld [vmem:[#allocation5] ss:$0 sm:$0xff]  ;;  %s512_s5 = scalar_lea.vmem %s334_s27, 128 }
  0x2a   :  { %402 = vmatpush3.msra.mxu1 %v148_v9  ;;  %431 = vmatpush3.msra.mxu0 %v245_v22  ;;  %v346_v46 = vld [vmem:[%s745_s6] ss:$0 sm:$0xff]  ;;  %p513_p10 = scmp.ne.s32.totalorder %s334_s27, %s512_s5  ;;  %p518_p12 = scmp.lt.s32.totalorder %s512_s5, %s512_s5 }
  0x2b   :  { %403 = vmatprep.subr.mxu1 %v542_v0  ;;  %432 = vmatprep.subr.mxu0 %v542_v0 }
  0x2c   :  { %404 = vmatpush3.msra.mxu1 %v147_v10  ;;  %433 = vmatpush3.msra.mxu0 %v244_v23  ;;  %p519_p13 = por %p518_p12, %p517_p11 }
  0x2d   :  { %405 = vmatprep.subr.mxu1 %v542_v0  ;;  %434 = vmatprep.subr.mxu0 %v542_v0 }
  0x2e   :  { %406 = vmatpush3.msra.mxu1 %v146_v11  ;;  %435 = vmatpush3.msra.mxu0 %v243_v24  ;;  %p520_p0 = pnand %p519_p13, %p513_p10 }
  0x2f   :  { %407 = vmatprep.subr.mxu1 %v542_v0  ;;  %436 = vmatprep.subr.mxu0 %v542_v0 }
  0x30   :  { %408 = vmatpush3.msra.mxu1 %v145_v12  ;;  %437 = vmatpush3.msra.mxu0 %v242_v25 }
  0x31   :  { %409 = vmatprep.subr.mxu1 %v542_v0  ;;  %438 = vmatprep.subr.mxu0 %v542_v0 }
  0x32   :  { %410 = vmatpush3.msra.mxu1 %v144_v13  ;;  %439 = vmatpush3.msra.mxu0 %v241_v26 }
  0x33   :  { %411 = vmatprep.subr.mxu1 %v542_v0  ;;  %440 = vmatprep.subr.mxu0 %v542_v0 }
  0x34   :  { %412 = vmatpush3.msra.mxu1 %v143_v14  ;;  %441 = vmatpush3.msra.mxu0 %v240_v32 }
  0x35   :  { %413 = vmatprep.subr.mxu1 %v542_v0  ;;  %442 = vmatprep.subr.mxu0 %v542_v0 }
  0x36   :  { %414 = vmatpush3.msra.mxu1 %v142_v15  ;;  %443 = vmatpush3.msra.mxu0 %v239_v33 }
  0x37   :  { %415 = vmatprep.subr.mxu1 %v542_v0  ;;  %444 = vmatprep.subr.mxu0 %v542_v0 }
  0x38   :  { %416 = vmatpush3.msra.mxu1 %v141_v16  ;;  %445 = vmatpush3.msra.mxu0 %v238_v34 }
  0x39   :  { %417 = vmatprep.subr.mxu1 %v542_v0  ;;  %446 = vmatprep.subr.mxu0 %v542_v0 }
  0x3a   :  { %418 = vmatpush3.msra.mxu1 %v140_v17  ;;  %447 = vmatpush3.msra.mxu0 %v237_v35 }
  0x3b   :  { %419 = vmatprep.subr.mxu1 %v542_v0  ;;  %448 = vmatprep.subr.mxu0 %v542_v0 }
  0x3c   :  { %420 = vmatpush3.msra.mxu1 %v139_v18  ;;  %449 = vmatpush3.msra.mxu0 %v236_v36 }
  0x3d   :  { %421 = vmatprep.subr.mxu1 %v542_v0  ;;  %450 = vmatprep.subr.mxu0 %v542_v0 }
  0x3e   :  { %422 = vmatpush3.msra.mxu1 %v138_v19  ;;  %451 = vmatpush3.msra.mxu0 %v235_v37 }
  0x3f   :  { %452 = vmatprep.subr.mxu0 %v542_v0 }
  0x40   :  { %453 = vmatpush3.msra.mxu0 %v234_v38 }
  0x41   :  { %454 = vmatprep.subr.mxu0 %v542_v0 }
  0x42   :  { %455 = vmatpush3.msra.mxu0 %v233_v39 }
  0x43   :  { %456 = vmatprep.subr.mxu0 %v542_v0 }
  0x44   :  { %457 = vmatpush3.msra.mxu0 %v232_v40 }
  0xe3   :  { %v133_v28 = vpop.f32.mrf.mxu0 }
  0xe4   :  { %v134_v29 = vadd.f32 %v343_v27, %v133_v28 }
  0xe5   :  { %v390_v30 = vpop.f32.mrf.mxu0 }
  0xe6   :  { %468 = vtanh.f32 %v134_v29 }
  0xf3   :  { %v469_v31 = vpop.eup %468 }
  0xf4   :  { %424 = vmatmul.mubr.f32.vlgmr.msra.gmra.mxu1 %v469_v31 }
 0x1b4   :  { %v227_v42 = vpop.f32.mrf.mxu1 }
 0x1b5   :  { %v228_v43 = vadd.f32 %v345_v41, %v227_v42 }
 0x1b6   :  { %v425_v44 = vpop.f32.mrf.mxu1 }
 0x1b7   :  { %470 = vtanh.f32 %v228_v43 }
 0x1c4   :  { %v471_v45 = vpop.eup %470 }
 0x1c5   :  { %459 = vmatmul.mubr.f32.vlgmr.msra.gmra.mxu0 %v471_v45 }
 0x285   :  { %v321_v47 = vpop.f32.mrf.mxu0 }
 0x286   :  { %v322_v48 = vadd.f32 %v346_v46, %v321_v47 }
 0x287   :  { %v460_v49 = vpop.f32.mrf.mxu0 }
 0x288   :  { %326 = vst.msk [vmem:[#allocation7] sm:$0xff] %vm325_vm2, %v322_v48 }
 0x289   :  { %523 = shalt.err (!%p520_p0)
}
 0x28a   :  { %336 = dma.vmem_to_hbm [thread:$0]  %s334_s27, 128, %s746_s7, [#allocation4]  }
 0x28b   :  { %536 = dma.done.wait [#allocation4], 128  }
 0x28c   :  { %537 = vsyncadd [#allocation4], 4294967168 }
 0x28d   :  { %340 = vsyncpa [#allocation3], 1 }
 0x28e   :  { %341 = vsyncpa [#allocation6], 1 }
 0x28f   :  { %342 = vsyncpa [#allocation4], 1 }

// kernel: tpu_custom_call.1
= control target key start
LH: loop header
LB: loop body
LE: loop exit
PB: predicated region body
PF: predicated region fallthrough
CT: control target
= control target key end

     0   :  { %12 = vsyncpa [#allocation3], 0  ;;  %s739_s0 = inlined_call_operand.vmem [shape: f32[8,16], index: 0, kind: input, shape index: {}]   ;;  %s740_s1 = inlined_call_operand.hbm [shape: f32[16,128], index: 1, kind: input, shape index: {}]   ;;  %s741_s2 = inlined_call_operand.vmem [shape: f32[1,128], index: 2, kind: input, shape index: {}]   ;;  %s742_s3 = inlined_call_operand.vmem [shape: f32[128,128], index: 3, kind: input, shape index: {}]   ;;  %s743_s4 = inlined_call_operand.hbm [shape: f32[1,128], index: 4, kind: input, shape index: {}]   ;;  %s744_s5 = inlined_call_operand.vmem [shape: f32[128,8], index: 5, kind: input, shape index: {}]   ;;  %s745_s6 = inlined_call_operand.vmem [shape: f32[1,8], index: 6, kind: input, shape index: {}]   ;;  %s746_s7 = inlined_call_operand.hbm [shape: f32[8,8], index: 7, kind: output, shape index: {}]  }
   0x1   :  { %13 = vsyncpa [#allocation6], 0 }
   0x2   :  { %14 = vsyncpa [#allocation4], 0  ;;  %s538_s24 = smov [#allocation2]  }
   0x3   :  { %s22_s25 = sshll.u32 %s538_s24, 4  ;;  %s23_s25 = int_to_ptr.vmem [resolvable:$true] %s22_s25 }
   0x4   :  { %s480_s26 = scalar_lea.vmem %s23_s25, 256  ;;  %p485_p1 = scmp.lt.s32.totalorder %s23_s25, %s23_s25 }
   0x5   :  { %p481_p0 = scmp.ne.s32.totalorder %s23_s25, %s480_s26  ;;  %p486_p2 = scmp.lt.s32.totalorder %s480_s26, %s480_s26 }
   0x7   :  { %p487_p3 = por %p486_p2, %p485_p1 }
   0x9   :  { %p488_p4 = pnand %p487_p3, %p481_p0 }
   0xb   :  { %491 = shalt.err (!%p488_p4)
}
   0xc   :  { %s539_s27 = smov 128   ;;  %s540_s28 = smov 8  }
   0xd   :  { %28 = dma.hbm_to_vmem [thread:$0]  %s740_s1, 256, %s23_s25, [#allocation3], %s539_s27, %s539_s27, %s540_s28  }
   0xe   :  { %s541_s8 = smov [#allocation5]  }
   0xf   :  { %s39_s9 = sshll.u32 %s541_s8, 4  ;;  %s40_s9 = int_to_ptr.vmem [resolvable:$true] %s39_s9 }
  0x10   :  { %s500_s10 = scalar_lea.vmem %s40_s9, 16  ;;  %s504_s11 = scalar_lea.vmem %s40_s9, 32 }
  0x11   :  { %p501_p5 = scmp.ne.s32.totalorder %s40_s9, %s500_s10  ;;  %p505_p6 = scmp.lt.s32.totalorder %s40_s9, %s40_s9 }
  0x12   :  { %p506_p7 = scmp.lt.s32.totalorder %s504_s11, %s500_s10 }
  0x14   :  { %p507_p8 = por %p506_p7, %p505_p6 }
  0x16   :  { %p508_p9 = pnand %p507_p8, %p501_p5 }
  0x18   :  { %511 = shalt.err (!%p508_p9)
}
  0x19   :  { %42 = dma.hbm_to_vmem [thread:$0]  %s743_s4, 16, %s40_s9, [#allocation6]  }
  0x1a   :  { %532 = dma.done.wait [#allocation3], 256  }
  0x1b   :  { %533 = vsyncadd [#allocation3], 4294967040 }
  0x1c   :  { %534 = dma.done.wait [#allocation6], 16  }
  0x1d   :  { %535 = vsyncadd [#allocation6], 4294967280  ;;  %v542_v0 = vmov 0.0   ;;  %vm543_vm0 = vmmov 0   ;;  %v55_v1 = vld [vmem:[#allocation2 + $0x8] sm:$0xff]  ;;  %v54_v2 = vld [vmem:[#allocation2] sm:$0xff] }
  0x1e   :  { %384 = vmatprep.subr.mxu0 %v542_v0  ;;  %388 = vmatprep.mubr.msk.f32.mxu0 %vm543_vm0, %v542_v0  ;;  %v53_v3 = vld [vmem:[%s739_s0] sm:$0xff]  ;;  %vm63_vm1 = vcmask 130048   ;;  %v153_v4 = vld [vmem:[%s742_s3 + $0x78] sm:$0xff]  ;;  %v152_v5 = vld [vmem:[%s742_s3 + $0x70] sm:$0xff]  ;;  %s544_s26 = smov [#allocation7]   ;;  %vm325_vm2 = vcmask 64512  }
  0x1f   :  { %391 = vmatprep.subr.mxu1 %v542_v0  ;;  %423 = vmatprep.mubr.msk.f32.mxu1 %vm543_vm0, %v542_v0  ;;  %v151_v6 = vld [vmem:[%s742_s3 + $0x68] sm:$0xff]  ;;  %v150_v7 = vld [vmem:[%s742_s3 + $0x60] sm:$0xff]  ;;  %v149_v8 = vld [vmem:[%s742_s3 + $0x58] sm:$0xff]  ;;  %s333_s27 = sshll.u32 %s544_s26, 4  ;;  %s334_s27 = int_to_ptr.vmem [resolvable:$true] %s333_s27 }
  0x20   :  { %385 = vmatpush3.msra.mxu0 %v55_v1  ;;  %392 = vmatpush3.msra.mxu1 %v153_v4  ;;  %v148_v9 = vld [vmem:[%s742_s3 + $0x50] sm:$0xff]  ;;  %v147_v10 = vld [vmem:[%s742_s3 + $0x48] sm:$0xff]  ;;  %v146_v11 = vld [vmem:[%s742_s3 + $0x40] sm:$0xff]  ;;  %p517_p11 = scmp.lt.s32.totalorder %s334_s27, %s334_s27 }
  0x21   :  { %386 = vmatprep.subr.mxu0 %v542_v0  ;;  %393 = vmatprep.subr.mxu1 %v542_v0  ;;  %v145_v12 = vld [vmem:[%s742_s3 + $0x38] sm:$0xff]  ;;  %v144_v13 = vld [vmem:[%s742_s3 + $0x30] sm:$0xff]  ;;  %v143_v14 = vld [vmem:[%s742_s3 + $0x28] sm:$0xff] }
  0x22   :  { %387 = vmatpush3.msra.mxu0 %v54_v2  ;;  %394 = vmatpush3.msra.mxu1 %v152_v5  ;;  %v142_v15 = vld [vmem:[%s742_s3 + $0x20] sm:$0xff]  ;;  %v141_v16 = vld [vmem:[%s742_s3 + $0x18] sm:$0xff]  ;;  %v140_v17 = vld [vmem:[%s742_s3 + $0x10] sm:$0xff] }
  0x23   :  { %389 = vmatmul.mubr.msk.f32.vlgmr.msra.gmra.mxu0 %vm63_vm1, %v53_v3  ;;  %395 = vmatprep.subr.mxu1 %v542_v0  ;;  %v139_v18 = vld [vmem:[%s742_s3 + $0x8] sm:$0xff]  ;;  %v138_v19 = vld [vmem:[%s742_s3] sm:$0xff]  ;;  %v247_v20 = vld [vmem:[%s744_s5 + $0x78] sm:$0xff] }
  0x24   :  { %426 = vmatprep.subr.mxu0 %v542_v0  ;;  %396 = vmatpush3.msra.mxu1 %v151_v6  ;;  %v246_v21 = vld [vmem:[%s744_s5 + $0x70] sm:$0xff]  ;;  %v245_v22 = vld [vmem:[%s744_s5 + $0x68] sm:$0xff]  ;;  %v244_v23 = vld [vmem:[%s744_s5 + $0x60] sm:$0xff] }
  0x25   :  { %458 = vmatprep.mubr.msk.f32.mxu0 %vm543_vm0, %v542_v0  ;;  %397 = vmatprep.subr.mxu1 %v542_v0  ;;  %v243_v24 = vld [vmem:[%s744_s5 + $0x58] sm:$0xff]  ;;  %v242_v25 = vld [vmem:[%s744_s5 + $0x50] sm:$0xff]  ;;  %v241_v26 = vld [vmem:[%s744_s5 + $0x48] sm:$0xff] }
  0x26   :  { %398 = vmatpush3.msra.mxu1 %v150_v7  ;;  %427 = vmatpush3.msra.mxu0 %v247_v20  ;;  %v343_v27 = vld [vmem:[%s741_s2] ss:$0 sm:$0xff]  ;;  %v239_v33 = vld [vmem:[%s744_s5 + $0x38] sm:$0xff]  ;;  %v238_v34 = vld [vmem:[%s744_s5 + $0x30] sm:$0xff] }
  0x27   :  { %399 = vmatprep.subr.mxu1 %v542_v0  ;;  %428 = vmatprep.subr.mxu0 %v542_v0  ;;  %v240_v32 = vld [vmem:[%s744_s5 + $0x40] sm:$0xff]  ;;  %v237_v35 = vld [vmem:[%s744_s5 + $0x28] sm:$0xff]  ;;  %v235_v37 = vld [vmem:[%s744_s5 + $0x18] sm:$0xff] }
  0x28   :  { %400 = vmatpush3.msra.mxu1 %v149_v8  ;;  %429 = vmatpush3.msra.mxu0 %v246_v21  ;;  %v236_v36 = vld [vmem:[%s744_s5 + $0x20] sm:$0xff]  ;;  %v234_v38 = vld [vmem:[%s744_s5 + $0x10] sm:$0xff]  ;;  %v233_v39 = vld [vmem:[%s744_s5 + $0x8] sm:$0xff] }
  0x29   :  { %401 = vmatprep.subr.mxu1 %v542_v0  ;;  %430 = vmatprep.subr.mxu0 %v542_v0  ;;  %v232_v40 = vld [vmem:[%s744_s5] sm:$0xff]  ;;  %v345_v41 = vld [vmem:[#allocation5] ss:$0 sm:$0xff]  ;;  %s512_s5 = scalar_lea.vmem %s334_s27, 128 }
  0x2a   :  { %402 = vmatpush3.msra.mxu1 %v148_v9  ;;  %431 = vmatpush3.msra.mxu0 %v245_v22  ;;  %v346_v46 = vld [vmem:[%s745_s6] ss:$0 sm:$0xff]  ;;  %p513_p10 = scmp.ne.s32.totalorder %s334_s27, %s512_s5  ;;  %p518_p12 = scmp.lt.s32.totalorder %s512_s5, %s512_s5 }
  0x2b   :  { %403 = vmatprep.subr.mxu1 %v542_v0  ;;  %432 = vmatprep.subr.mxu0 %v542_v0 }
  0x2c   :  { %404 = vmatpush3.msra.mxu1 %v147_v10  ;;  %433 = vmatpush3.msra.mxu0 %v244_v23  ;;  %p519_p13 = por %p518_p12, %p517_p11 }
  0x2d   :  { %405 = vmatprep.subr.mxu1 %v542_v0  ;;  %434 = vmatprep.subr.mxu0 %v542_v0 }
  0x2e   :  { %406 = vmatpush3.msra.mxu1 %v146_v11  ;;  %435 = vmatpush3.msra.mxu0 %v243_v24  ;;  %p520_p0 = pnand %p519_p13, %p513_p10 }
  0x2f   :  { %407 = vmatprep.subr.mxu1 %v542_v0  ;;  %436 = vmatprep.subr.mxu0 %v542_v0 }
  0x30   :  { %408 = vmatpush3.msra.mxu1 %v145_v12  ;;  %437 = vmatpush3.msra.mxu0 %v242_v25 }
  0x31   :  { %409 = vmatprep.subr.mxu1 %v542_v0  ;;  %438 = vmatprep.subr.mxu0 %v542_v0 }
  0x32   :  { %410 = vmatpush3.msra.mxu1 %v144_v13  ;;  %439 = vmatpush3.msra.mxu0 %v241_v26 }
  0x33   :  { %411 = vmatprep.subr.mxu1 %v542_v0  ;;  %440 = vmatprep.subr.mxu0 %v542_v0 }
  0x34   :  { %412 = vmatpush3.msra.mxu1 %v143_v14  ;;  %441 = vmatpush3.msra.mxu0 %v240_v32 }
  0x35   :  { %413 = vmatprep.subr.mxu1 %v542_v0  ;;  %442 = vmatprep.subr.mxu0 %v542_v0 }
  0x36   :  { %414 = vmatpush3.msra.mxu1 %v142_v15  ;;  %443 = vmatpush3.msra.mxu0 %v239_v33 }
  0x37   :  { %415 = vmatprep.subr.mxu1 %v542_v0  ;;  %444 = vmatprep.subr.mxu0 %v542_v0 }
  0x38   :  { %416 = vmatpush3.msra.mxu1 %v141_v16  ;;  %445 = vmatpush3.msra.mxu0 %v238_v34 }
  0x39   :  { %417 = vmatprep.subr.mxu1 %v542_v0  ;;  %446 = vmatprep.subr.mxu0 %v542_v0 }
  0x3a   :  { %418 = vmatpush3.msra.mxu1 %v140_v17  ;;  %447 = vmatpush3.msra.mxu0 %v237_v35 }
  0x3b   :  { %419 = vmatprep.subr.mxu1 %v542_v0  ;;  %448 = vmatprep.subr.mxu0 %v542_v0 }
  0x3c   :  { %420 = vmatpush3.msra.mxu1 %v139_v18  ;;  %449 = vmatpush3.msra.mxu0 %v236_v36 }
  0x3d   :  { %421 = vmatprep.subr.mxu1 %v542_v0  ;;  %450 = vmatprep.subr.mxu0 %v542_v0 }
  0x3e   :  { %422 = vmatpush3.msra.mxu1 %v138_v19  ;;  %451 = vmatpush3.msra.mxu0 %v235_v37 }
  0x3f   :  { %452 = vmatprep.subr.mxu0 %v542_v0 }
  0x40   :  { %453 = vmatpush3.msra.mxu0 %v234_v38 }
  0x41   :  { %454 = vmatprep.subr.mxu0 %v542_v0 }
  0x42   :  { %455 = vmatpush3.msra.mxu0 %v233_v39 }
  0x43   :  { %456 = vmatprep.subr.mxu0 %v542_v0 }
  0x44   :  { %457 = vmatpush3.msra.mxu0 %v232_v40 }
  0xe3   :  { %v133_v28 = vpop.f32.mrf.mxu0 }
  0xe4   :  { %v134_v29 = vadd.f32 %v343_v27, %v133_v28 }
  0xe5   :  { %v390_v30 = vpop.f32.mrf.mxu0 }
  0xe6   :  { %468 = vtanh.f32 %v134_v29 }
  0xf3   :  { %v469_v31 = vpop.eup %468 }
  0xf4   :  { %424 = vmatmul.mubr.f32.vlgmr.msra.gmra.mxu1 %v469_v31 }
 0x1b4   :  { %v227_v42 = vpop.f32.mrf.mxu1 }
 0x1b5   :  { %v228_v43 = vadd.f32 %v345_v41, %v227_v42 }
 0x1b6   :  { %v425_v44 = vpop.f32.mrf.mxu1 }
 0x1b7   :  { %470 = vtanh.f32 %v228_v43 }
 0x1c4   :  { %v471_v45 = vpop.eup %470 }
 0x1c5   :  { %459 = vmatmul.mubr.f32.vlgmr.msra.gmra.mxu0 %v471_v45 }
 0x285   :  { %v321_v47 = vpop.f32.mrf.mxu0 }
 0x286   :  { %v322_v48 = vadd.f32 %v346_v46, %v321_v47 }
 0x287   :  { %v460_v49 = vpop.f32.mrf.mxu0 }
 0x288   :  { %326 = vst.msk [vmem:[#allocation7] sm:$0xff] %vm325_vm2, %v322_v48 }
 0x289   :  { %523 = shalt.err (!%p520_p0)
}
 0x28a   :  { %336 = dma.vmem_to_hbm [thread:$0]  %s334_s27, 128, %s746_s7, [#allocation4]  }
 0x28b   :  { %536 = dma.done.wait [#allocation4], 128  }
 0x28c   :  { %537 = vsyncadd [#allocation4], 4294967168 }
 0x28d   :  { %340 = vsyncpa [#allocation3], 1 }
 0x28e   :  { %341 = vsyncpa [#allocation6], 1 }
 0x28f   :  { %342 = vsyncpa [#allocation4], 1 }

</bundles_post_ra>
